<compile_context>
chip_gen: v6e
topology: v6e:2x2x1
jax: 0.10.0
libtpu: 0.0.40
codegen_flags: <defaults>
</compile_context>

<pallas_src>
import functools

import jax
import jax.numpy as jnp
from jax.experimental import pallas as pl
from jax.experimental.pallas import tpu as pltpu


def _round_up(x, n):
    return pl.cdiv(x, n) * n


def _fcn_kernel(xT_ref, w_in_ref, b_in_ref, w_h_ref, b_h_ref,
                w_out_ref, b_out_ref, oT_ref, *, n_hidden_layers):
    """Whole MLP forward on one (features, batch-tile) slab.

    All activations are (features, batch): batch on lanes, features on
    sublanes.  The ScaledReLU scale is already folded into the weights and
    biases, so activations are plain relu.
    """
    # input layer: (H, n_in) @ (n_in, block_b) -> (H, block_b)
    h = jnp.dot(w_in_ref[...], xT_ref[...], preferred_element_type=jnp.float32)
    h = jnp.maximum(h + b_in_ref[...], 0.0)

    # hidden layers: static unroll (small, fixed layer count)
    for l in range(n_hidden_layers):
        h = jnp.dot(w_h_ref[l], h, preferred_element_type=jnp.float32)
        h = jnp.maximum(h + b_h_ref[l], 0.0)

    # output layer: (n_out, H) @ (H, block_b) -> (n_out, block_b), no activation
    y = jnp.dot(w_out_ref[...], h, preferred_element_type=jnp.float32)
    y = y + b_out_ref[...]
    oT_ref[...] = y.astype(oT_ref.dtype)         # lane-dense store


def fcn_forward(x, params, *, m=1.0, block_b=None):
    """Forward pass equivalent to FCN(...).forward(x) from the PyTorch spec.

    `params` are in native PyTorch layout:
        w_in  (H, n_in),         b_in  (H,)
        w_h   (n_hidden, H, H),  b_h   (n_hidden, H)
        w_out (n_out, H),        b_out (n_out,)
    """
    w_in, b_in, w_h, b_h, w_out, b_out = params
    B, n_in = x.shape
    H = w_in.shape[0]
    n_out = w_out.shape[0]
    n_hidden = w_h.shape[0]
    dtype = w_in.dtype

    # ---- tiling: batch on the lane axis, tile size a multiple of 128 --------
    if block_b is None:
        block_b = min(1024, _round_up(B, 128))   # big tiles amortize grid overhead
    block_b = int(_round_up(block_b, 128))       # keep output stores lane-dense
    B_pad = int(_round_up(B, block_b))
    grid = B_pad // block_b

    # ---- fold ScaledReLU scale m into the activated layers (exact) ----------
    # In a training loop this would be done once per parameter update; here it
    # is a handful of tiny XLA ops on weight-sized arrays, outside the kernel.
    m_c = jnp.asarray(m, dtype)
    w_in_k = (w_in * m_c).astype(dtype)
    b_in_k = (b_in * m_c).reshape(H, 1).astype(dtype)
    w_h_k = (w_h * m_c).astype(dtype)
    b_h_k = (b_h * m_c).reshape(n_hidden, H, 1).astype(dtype)
    w_out_k = w_out.astype(dtype)
    b_out_k = b_out.reshape(n_out, 1).astype(dtype)

    # ---- transpose + pad the input so batch sits on the lane axis -----------
    xT = jnp.transpose(x.astype(dtype))          # (n_in, B)
    if B_pad != B:
        xT = jnp.pad(xT, ((0, 0), (0, B_pad - B)))

    kernel = functools.partial(_fcn_kernel, n_hidden_layers=n_hidden)
    vmem = pltpu.MemorySpace.VMEM
    outT = pl.pallas_call(
        kernel,
        out_shape=jax.ShapeDtypeStruct((n_out, B_pad), x.dtype),
        grid=(grid,),
        in_specs=[
            pl.BlockSpec((n_in, block_b), lambda i: (0, i)),   # x^T batch tile
            pl.BlockSpec(memory_space=vmem),                   # w_in (whole, VMEM-resident)
            pl.BlockSpec(memory_space=vmem),                   # b_in
            pl.BlockSpec(memory_space=vmem),                   # w_h stack
            pl.BlockSpec(memory_space=vmem),                   # b_h stack
            pl.BlockSpec(memory_space=vmem),                   # w_out
            pl.BlockSpec(memory_space=vmem),                   # b_out
        ],
        out_specs=pl.BlockSpec((n_out, block_b), lambda i: (0, i)),
        compiler_params=pltpu.CompilerParams(
            dimension_semantics=("parallel",)),                # megacore-friendly
    )(xT, w_in_k, b_in_k, w_h_k, b_h_k, w_out_k, b_out_k)

    return jnp.transpose(outT)[:B]               # back to (B, n_out), drop padding


def _xavier_uniform(key, fan_out, fan_in):
    # matches torch.nn.init.xavier_uniform_(gain=1.0) on a (out, in) weight
    bound = (6.0 / (fan_in + fan_out)) ** 0.5
    return jax.random.uniform(key, (fan_out, fan_in), jnp.float32, -bound, bound)


def init_fcn_params(key, n_input, n_output, n_hidden, n_layers):
    """Matches FCN.__init__: xavier_uniform weights, zero biases, PyTorch layout."""
    n_hidden_layers = n_layers - 1
    keys = jax.random.split(key, n_hidden_layers + 2)
    w_in = _xavier_uniform(keys[0], n_hidden, n_input)
    b_in = jnp.zeros((n_hidden,), jnp.float32)
    w_h = jnp.stack([_xavier_uniform(keys[1 + l], n_hidden, n_hidden)
                     for l in range(n_hidden_layers)], axis=0)
    b_h = jnp.zeros((n_hidden_layers, n_hidden), jnp.float32)
    w_out = _xavier_uniform(keys[-1], n_output, n_hidden)
    b_out = jnp.zeros((n_output,), jnp.float32)
    return (w_in, b_in, w_h, b_h, w_out, b_out)


def fcn_reference(x, params, m=1.0):
    w_in, b_in, w_h, b_h, w_out, b_out = params
    h = jnp.maximum(m * (x @ w_in.T + b_in), 0.0)
    for l in range(w_h.shape[0]):
        h = jnp.maximum(m * (h @ w_h[l].T + b_h[l]), 0.0)
    return h @ w_out.T + b_out


if __name__ == "__main__":
    # FCN(N_INPUT=2, N_OUTPUT=1, N_HIDDEN=32, N_LAYERS=3, m=1.5) — typical PINN sizes.
    N_INPUT, N_OUTPUT, N_HIDDEN, N_LAYERS, M = 2, 1, 32, 3, 1.5
    BATCH = 200  # deliberately NOT a multiple of the tile (exercises padding path)

    key = jax.random.PRNGKey(0)
    k_params, k_x = jax.random.split(key)
    params = init_fcn_params(k_params, N_INPUT, N_OUTPUT, N_HIDDEN, N_LAYERS)
    x = jax.random.normal(k_x, (BATCH, N_INPUT), jnp.float32)

    ref = fcn_reference(x, params, m=M)

    # default tile (auto: multiple of 128, sized to amortize per-step overhead)
    out = jax.block_until_ready(fcn_forward(x, params, m=M))
    assert out.shape == (BATCH, N_OUTPUT)
    assert jnp.allclose(out, ref, atol=1e-4, rtol=1e-4)

    # explicit 128-wide tile -> 2 grid steps (even grid keeps both v7x TCs busy)
    out2 = jax.block_until_ready(fcn_forward(x, params, m=M, block_b=128))
    assert out2.shape == (BATCH, N_OUTPUT)
    assert jnp.allclose(out2, ref, atol=1e-4, rtol=1e-4)

    print("KERNEL_OK")
</pallas_src>

<mosaic_0001>
module attributes {stable_mosaic.version = 11 : i64} {
  func.func @_fcn_kernel(%arg0: i32, %arg1: memref<2x256xf32, #tpu.memory_space<vmem>>, %arg2: memref<32x2xf32, #tpu.memory_space<vmem>>, %arg3: memref<32x1xf32, #tpu.memory_space<vmem>>, %arg4: memref<2x32x32xf32, #tpu.memory_space<vmem>>, %arg5: memref<2x32x1xf32, #tpu.memory_space<vmem>>, %arg6: memref<1x32xf32, #tpu.memory_space<vmem>>, %arg7: memref<1x1xf32, #tpu.memory_space<vmem>>, %arg8: memref<1x256xf32, #tpu.memory_space<vmem>>) attributes {dimension_semantics = [#tpu.dimension_semantics<parallel>], iteration_bounds = array<i64: 1>, scalar_prefetch = 0 : i64, scratch_operands = 0 : i64, tpu.core_type = #tpu.core_type<tc>, window_params = [{transform_indices = @transform_0, window_bounds = array<i64: 2, 256>}, {pipeline_mode = #tpu.pipeline_mode<synchronous>, transform_indices = @transform_1, window_bounds = array<i64: 32, 2>}, {pipeline_mode = #tpu.pipeline_mode<synchronous>, transform_indices = @transform_2, window_bounds = array<i64: 32, 1>}, {pipeline_mode = #tpu.pipeline_mode<synchronous>, transform_indices = @transform_3, window_bounds = array<i64: 2, 32, 32>}, {pipeline_mode = #tpu.pipeline_mode<synchronous>, transform_indices = @transform_4, window_bounds = array<i64: 2, 32, 1>}, {pipeline_mode = #tpu.pipeline_mode<synchronous>, transform_indices = @transform_5, window_bounds = array<i64: 1, 32>}, {pipeline_mode = #tpu.pipeline_mode<synchronous>, transform_indices = @transform_6, window_bounds = array<i64: 1, 1>}, {transform_indices = @transform_7, window_bounds = array<i64: 1, 256>}]} {
    %c0 = arith.constant 0 : index
    %c0_0 = arith.constant 0 : index
    %0 = vector.load %arg2[%c0, %c0_0] : memref<32x2xf32, #tpu.memory_space<vmem>>, vector<32x2xf32>
    %c0_1 = arith.constant 0 : index
    %c0_2 = arith.constant 0 : index
    %1 = vector.load %arg1[%c0_1, %c0_2] : memref<2x256xf32, #tpu.memory_space<vmem>>, vector<2x256xf32>
    %cst = arith.constant dense<0.000000e+00> : vector<32x256xf32>
    %2 = tpu.matmul %0, %1, %cst {dimension_numbers = #tpu.dot_dimension_numbers<[1], [0], [0], [1], [0, 0, 1, 1], [], []>} : vector<32x2xf32>, vector<2x256xf32>, vector<32x256xf32> -> vector<32x256xf32>
    %c0_3 = arith.constant 0 : index
    %c0_4 = arith.constant 0 : index
    %3 = vector.load %arg3[%c0_3, %c0_4] : memref<32x1xf32, #tpu.memory_space<vmem>>, vector<32x1xf32>
    %4 = vector.broadcast %3 : vector<32x1xf32> to vector<32x256xf32>
    %5 = arith.addf %2, %4 : vector<32x256xf32>
    %cst_5 = arith.constant 0.000000e+00 : f32
    %6 = vector.broadcast %cst_5 : f32 to vector<32x256xf32>
    %7 = arith.maximumf %5, %6 : vector<32x256xf32>
    %c0_6 = arith.constant 0 : index
    %c0_7 = arith.constant 0 : index
    %c0_8 = arith.constant 0 : index
    %8 = vector.load %arg4[%c0_6, %c0_7, %c0_8] : memref<2x32x32xf32, #tpu.memory_space<vmem>>, vector<1x32x32xf32>
    %9 = vector.shape_cast %8 : vector<1x32x32xf32> to vector<32x32xf32>
    %cst_9 = arith.constant dense<0.000000e+00> : vector<32x256xf32>
    %10 = tpu.matmul %9, %7, %cst_9 {dimension_numbers = #tpu.dot_dimension_numbers<[1], [0], [0], [1], [0, 0, 1, 1], [], []>} : vector<32x32xf32>, vector<32x256xf32>, vector<32x256xf32> -> vector<32x256xf32>
    %c0_10 = arith.constant 0 : index
    %c0_11 = arith.constant 0 : index
    %c0_12 = arith.constant 0 : index
    %11 = vector.load %arg5[%c0_10, %c0_11, %c0_12] : memref<2x32x1xf32, #tpu.memory_space<vmem>>, vector<1x32x1xf32>
    %12 = vector.shape_cast %11 : vector<1x32x1xf32> to vector<32x1xf32>
    %13 = vector.broadcast %12 : vector<32x1xf32> to vector<32x256xf32>
    %14 = arith.addf %10, %13 : vector<32x256xf32>
    %cst_13 = arith.constant 0.000000e+00 : f32
    %15 = vector.broadcast %cst_13 : f32 to vector<32x256xf32>
    %16 = arith.maximumf %14, %15 : vector<32x256xf32>
    %c1 = arith.constant 1 : index
    %c0_14 = arith.constant 0 : index
    %c0_15 = arith.constant 0 : index
    %17 = vector.load %arg4[%c1, %c0_14, %c0_15] : memref<2x32x32xf32, #tpu.memory_space<vmem>>, vector<1x32x32xf32>
    %18 = vector.shape_cast %17 : vector<1x32x32xf32> to vector<32x32xf32>
    %cst_16 = arith.constant dense<0.000000e+00> : vector<32x256xf32>
    %19 = tpu.matmul %18, %16, %cst_16 {dimension_numbers = #tpu.dot_dimension_numbers<[1], [0], [0], [1], [0, 0, 1, 1], [], []>} : vector<32x32xf32>, vector<32x256xf32>, vector<32x256xf32> -> vector<32x256xf32>
    %c1_17 = arith.constant 1 : index
    %c0_18 = arith.constant 0 : index
    %c0_19 = arith.constant 0 : index
    %20 = vector.load %arg5[%c1_17, %c0_18, %c0_19] : memref<2x32x1xf32, #tpu.memory_space<vmem>>, vector<1x32x1xf32>
    %21 = vector.shape_cast %20 : vector<1x32x1xf32> to vector<32x1xf32>
    %22 = vector.broadcast %21 : vector<32x1xf32> to vector<32x256xf32>
    %23 = arith.addf %19, %22 : vector<32x256xf32>
    %cst_20 = arith.constant 0.000000e+00 : f32
    %24 = vector.broadcast %cst_20 : f32 to vector<32x256xf32>
    %25 = arith.maximumf %23, %24 : vector<32x256xf32>
    %c0_21 = arith.constant 0 : index
    %c0_22 = arith.constant 0 : index
    %26 = vector.load %arg6[%c0_21, %c0_22] : memref<1x32xf32, #tpu.memory_space<vmem>>, vector<1x32xf32>
    %cst_23 = arith.constant dense<0.000000e+00> : vector<1x256xf32>
    %27 = tpu.matmul %26, %25, %cst_23 {dimension_numbers = #tpu.dot_dimension_numbers<[1], [0], [0], [1], [0, 0, 1, 1], [], []>} : vector<1x32xf32>, vector<32x256xf32>, vector<1x256xf32> -> vector<1x256xf32>
    %c0_24 = arith.constant 0 : index
    %c0_25 = arith.constant 0 : index
    %28 = vector.load %arg7[%c0_24, %c0_25] : memref<1x1xf32, #tpu.memory_space<vmem>>, vector<1x1xf32>
    %29 = vector.broadcast %28 : vector<1x1xf32> to vector<1x256xf32>
    %30 = arith.addf %27, %29 : vector<1x256xf32>
    %c0_26 = arith.constant 0 : index
    %c0_27 = arith.constant 0 : index
    %31 = vector.load %arg8[%c0_26, %c0_27] : memref<1x256xf32, #tpu.memory_space<vmem>>, vector<1x256xf32>
    tpu.vector_store %arg8[%c0_26, %c0_27], %30 {strides = array<i32>} : memref<1x256xf32, #tpu.memory_space<vmem>>, vector<1x256xf32>,
    return
  }
  func.func @transform_0(%arg0: i32) -> (i32, i32) {
    %c0_i32 = arith.constant 0 : i32
    %c0_i32_0 = arith.constant 0 : i32
    return %c0_i32, %arg0 : i32, i32
  }
  func.func @transform_1(%arg0: i32) -> (i32, i32) {
    %c0_i32 = arith.constant 0 : i32
    %c0_i32_0 = arith.constant 0 : i32
    %c0_i32_1 = arith.constant 0 : i32
    return %c0_i32, %c0_i32_0 : i32, i32
  }
  func.func @transform_2(%arg0: i32) -> (i32, i32) {
    %c0_i32 = arith.constant 0 : i32
    %c0_i32_0 = arith.constant 0 : i32
    %c0_i32_1 = arith.constant 0 : i32
    return %c0_i32, %c0_i32_0 : i32, i32
  }
  func.func @transform_3(%arg0: i32) -> (i32, i32, i32) {
    %c0_i32 = arith.constant 0 : i32
    %c0_i32_0 = arith.constant 0 : i32
    %c0_i32_1 = arith.constant 0 : i32
    %c0_i32_2 = arith.constant 0 : i32
    return %c0_i32, %c0_i32_0, %c0_i32_1 : i32, i32, i32
  }
  func.func @transform_4(%arg0: i32) -> (i32, i32, i32) {
    %c0_i32 = arith.constant 0 : i32
    %c0_i32_0 = arith.constant 0 : i32
    %c0_i32_1 = arith.constant 0 : i32
    %c0_i32_2 = arith.constant 0 : i32
    return %c0_i32, %c0_i32_0, %c0_i32_1 : i32, i32, i32
  }
  func.func @transform_5(%arg0: i32) -> (i32, i32) {
    %c0_i32 = arith.constant 0 : i32
    %c0_i32_0 = arith.constant 0 : i32
    %c0_i32_1 = arith.constant 0 : i32
    return %c0_i32, %c0_i32_0 : i32, i32
  }
  func.func @transform_6(%arg0: i32) -> (i32, i32) {
    %c0_i32 = arith.constant 0 : i32
    %c0_i32_0 = arith.constant 0 : i32
    %c0_i32_1 = arith.constant 0 : i32
    return %c0_i32, %c0_i32_0 : i32, i32
  }
  func.func @transform_7(%arg0: i32) -> (i32, i32) {
    %c0_i32 = arith.constant 0 : i32
    %c0_i32_0 = arith.constant 0 : i32
    return %c0_i32, %arg0 : i32, i32
  }
}

</mosaic_0001>

<bundles_post_ra>
// kernel: tpu_custom_call.1
= control target key start
LH: loop header
LB: loop body
LE: loop exit
PB: predicated region body
PF: predicated region fallthrough
CT: control target
= control target key end

     0   :  { %s789_s0 = inlined_call_operand.vmem [shape: f32[2,256], index: 0, kind: input, shape index: {}]   ;;  %s790_s1 = inlined_call_operand.vmem [shape: f32[32,2], index: 1, kind: input, shape index: {}]   ;;  %s791_s2 = inlined_call_operand.vmem [shape: f32[32,1], index: 2, kind: input, shape index: {}]   ;;  %s792_s3 = inlined_call_operand.vmem [shape: f32[2,32,32], index: 3, kind: input, shape index: {}]   ;;  %s793_s4 = inlined_call_operand.vmem [shape: f32[2,32,1], index: 4, kind: input, shape index: {}]   ;;  %s794_s5 = inlined_call_operand.vmem [shape: f32[1,32], index: 5, kind: input, shape index: {}]   ;;  %s795_s6 = inlined_call_operand.<no memory space> [shape: f32[1,1], index: 6, kind: input, shape index: {}]   ;;  %s796_s7 = inlined_call_operand.hbm [shape: f32[1,256], index: 7, kind: output, shape index: {}]  }
   0x1   :  { %v12_v0 = vstv %s795_s6 }
   0x2   :  { %13 = vst [vmem:[#allocation2] sm:$0x1] %v12_v0 }
   0x3   :  { %v581_v1 = vld.sshfl [vmem:[%s789_s0] sm:$0x33 pattern:$0x76325410]  ;;  %vm80_vm0 = vcmask 1041408   ;;  %v635_v3 = vmov 0.0  }
   0x4   :  { %v66_v2 = vcombine.high %v581_v1, %v581_v1  ;;  %161 = vmatprep.mubr.f32.mxu1 %v635_v3  ;;  %149 = vmatprep.mubr.f32.mxu0 %v635_v3  ;;  %v31_v4 = vld [vmem:[%s790_s1 + $0x10] sm:$0xff]  ;;  %vm67_vm1 = vcmask 15360   ;;  %v29_v5 = vld [vmem:[%s790_s1] sm:$0xff]  ;;  %v636_v6 = vmov 0   ;;  %v37_v7 = vld [vmem:[%s791_s2 + $0x18] sm:$0xff] }
   0x5   :  { %611 = vset.pattern.permute.xlu0 %v636_v6  ;;  %612 = vset.pattern.permute.xlu1 %v636_v6  ;;  %v35_v8 = vld [vmem:[%s791_s2 + $0x8] sm:$0xff]  ;;  %v32_v9 = vld [vmem:[%s790_s1 + $0x18] sm:$0xff] }
   0x6   :  { %605 = vmatprep.subr.msk.mxu1 %vm80_vm0, %v66_v2  ;;  %582 = vmatprep.subr.msk.mxu0 %vm80_vm0, %v66_v2  ;;  %v30_v10 = vld [vmem:[%s790_s1 + $0x8] sm:$0xff] }
   0x7   :  { %606 = vmatpush1.msk.msra.mxu1 %vm80_vm0, %v581_v1  ;;  %583 = vmatpush1.msk.msra.mxu0 %vm80_vm0, %v581_v1 }
   0x8   :  { %586 = vmatmul.mubr.msk.f32.vlgmr.msra.gmra.mxu1 %vm67_vm1, %v31_v4  ;;  %584 = vmatmul.mubr.msk.f32.vlgmr.msra.gmra.mxu0 %vm67_vm1, %v29_v5 }
   0x9   :  { %167 = vmatprep.mubr.f32.mxu1 %v635_v3  ;;  %155 = vmatprep.mubr.f32.mxu0 %v635_v3 }
   0xa   :  { %14 = vsyncpa [#allocation4], 0  ;;  %55 = vperm.xlu0 %611, %v37_v7   ;;  %45 = vperm.xlu1 %612, %v35_v8   ;;  %v36_v11 = vld [vmem:[%s791_s2 + $0x10] sm:$0xff]  ;;  %v34_v12 = vld [vmem:[%s791_s2] sm:$0xff]  ;;  %vm210_vm2 = vcmask 261120   ;;  %s638_s22 = smov [#allocation3]  }
   0xb   :  { %v189_v13 = vld [vmem:[%s793_s4 + $0x18] sm:$0xff]  ;;  %v188_v14 = vld [vmem:[%s793_s4 + $0x10] sm:$0xff]  ;;  %v187_v15 = vld [vmem:[%s793_s4 + $0x8] sm:$0xff] }
   0xc   :  { %587 = vmatmul.mubr.msk.f32.gmra.mxu1 %vm67_vm1, %v32_v9  ;;  %585 = vmatmul.mubr.msk.f32.gmra.mxu0 %vm67_vm1, %v30_v10  ;;  %v186_v16 = vld [vmem:[%s793_s4] sm:$0xff]  ;;  %v599_v17 = vld [vmem:[%s793_s4 + $0x38] sm:$0xff]  ;;  %v598_v18 = vld [vmem:[%s793_s4 + $0x30] sm:$0xff] }
   0xd   :  { %287 = vmatprep.mubr.f32.mxu1 %v635_v3  ;;  %426 = vmatprep.mubr.f32.mxu0 %v635_v3  ;;  %v597_v19 = vld [vmem:[%s793_s4 + $0x28] sm:$0xff]  ;;  %v596_v20 = vld [vmem:[%s793_s4 + $0x20] sm:$0xff]  ;;  %v184_v52 = vld [vmem:[%s792_s3 + $0x10] sm:$0xff] }
   0xe   :  { %50 = vperm.xlu0 %611, %v36_v11   ;;  %40 = vperm.xlu1 %612, %v34_v12   ;;  %v460_v21 = vld [vmem:[#allocation2] sm:$0x1]  ;;  %v183_v51 = vld [vmem:[%s792_s3 + $0x8] sm:$0xff]  ;;  %v185_v53 = vld [vmem:[%s792_s3 + $0x18] sm:$0xff] }
   0xf   :  { %v182_v50 = vld [vmem:[%s792_s3] sm:$0xff] }
  0x12   :  { %207 = vperm.xlu0 %611, %v189_v13   ;;  %202 = vperm.xlu1 %612, %v188_v14  }
  0x16   :  { %197 = vperm.xlu0 %611, %v187_v15   ;;  %192 = vperm.xlu1 %612, %v186_v16  }
  0x1a   :  { %347 = vperm.xlu0 %611, %v599_v17   ;;  %342 = vperm.xlu1 %612, %v598_v18  }
  0x1e   :  { %337 = vperm.xlu0 %611, %v597_v19   ;;  %332 = vperm.xlu1 %612, %v596_v20   ;;  %v592_v19 = vld [vmem:[%s792_s3 + $0x20] sm:$0xff]  ;;  %v593_v20 = vld [vmem:[%s792_s3 + $0x28] sm:$0xff] }
  0x22   :  { %463 = vperm.xlu0 %611, %v460_v21   ;;  %v594_v21 = vld [vmem:[%s792_s3 + $0x30] sm:$0xff] }
  0x85   :  { %v56_v22 = vpop.permute.xlu0 %55  ;;  %v46_v27 = vpop.permute.xlu1 %45 }
  0x89   :  { %v51_v30 = vpop.permute.xlu0 %50  ;;  %v41_v39 = vpop.permute.xlu1 %40 }
  0x8d   :  { %v208_v59 = vpop.permute.xlu0 %207  ;;  %v203_v61 = vpop.permute.xlu1 %202 }
  0x91   :  { %v198_v4 = vpop.permute.xlu0 %197  ;;  %v193_v8 = vpop.permute.xlu1 %192 }
  0xc8   :  { %v163_v23 = vpop.f32.mrf.mxu1  ;;  %v151_v24 = vpop.f32.mrf.mxu0 }
  0xc9   :  { %v164_v36 = vadd.f32 %v163_v23, %v51_v30  ;;  %v152_v45 = vadd.f32 %v151_v24, %v41_v39 }
  0xca   :  { %v165_v25 = vpop.f32.mrf.mxu1  ;;  %v153_v26 = vpop.f32.mrf.mxu0 }
  0xcb   :  { %v166_v34 = vadd.f32 %v165_v25, %v51_v30  ;;  %v154_v43 = vadd.f32 %v153_v26, %v41_v39  ;;  %v178_v44 = vmax.f32 %v164_v36, 0.0  ;;  %v174_v49 = vmax.f32 %v152_v45, 0.0  ;;  %v343_v30 = vpop.permute.xlu1 %342 }
  0xcc   :  { %v169_v28 = vpop.f32.mrf.mxu1  ;;  %v157_v29 = vpop.f32.mrf.mxu0 }
  0xcd   :  { %v170_v31 = vadd.f32 %v169_v28, %v56_v22  ;;  %v158_v41 = vadd.f32 %v157_v29, %v46_v27  ;;  %v179_v42 = vmax.f32 %v166_v34, 0.0  ;;  %v175_v48 = vmax.f32 %v154_v43, 0.0  ;;  %v348_v28 = vpop.permute.xlu0 %347 }
  0xce   :  { %v171_v32 = vpop.f32.mrf.mxu1  ;;  %v159_v33 = vpop.f32.mrf.mxu0 }
  0xcf   :  { %v172_v35 = vadd.f32 %v171_v32, %v56_v22  ;;  %v160_v38 = vadd.f32 %v159_v33, %v46_v27  ;;  %v180_v40 = vmax.f32 %v170_v31, 0.0  ;;  %v176_v47 = vmax.f32 %v158_v41, 0.0  ;;  %v595_v22 = vld [vmem:[%s792_s3 + $0x38] sm:$0xff]  ;;  %v333_v39 = vpop.permute.xlu1 %332 }
  0xd1   :  { %v181_v37 = vmax.f32 %v172_v35, 0.0  ;;  %v177_v46 = vmax.f32 %v160_v38, 0.0 }
  0xd3   :  { %247 = vmatprep.subr.mxu1 %v181_v37 }
  0xd4   :  { %248 = vmatpush1.msra.mxu1 %v180_v40 }
  0xd5   :  { %249 = vmatprep.subr.mxu1 %v179_v42 }
  0xd6   :  { %250 = vmatpush1.msra.mxu1 %v178_v44 }
  0xd7   :  { %251 = vmatprep.subr.mxu1 %v177_v46 }
  0xd8   :  { %252 = vmatpush1.msra.mxu1 %v176_v47 }
  0xd9   :  { %253 = vmatprep.subr.mxu1 %v175_v48 }
  0xda   :  { %254 = vmatpush1.msra.mxu1 %v174_v49 }
  0xdb   :  { %588 = vmatmul.mubr.msk.f32.vlgmr.msra.gmra.mxu1 %vm210_vm2, %v182_v50  ;;  %v459_v50 = vld [vmem:[%s794_s5] sm:$0x1]  ;;  %s573_s5 = sshll.u32 %s638_s22, 4  ;;  %s574_s5 = int_to_ptr.vmem [resolvable:$true] %s573_s5 }
  0xdc   :  { %293 = vmatprep.mubr.f32.mxu1 %v635_v3  ;;  %s613_s23 = scalar_lea.vmem %s574_s5, 32  ;;  %p618_p1 = scmp.lt.s32.totalorder %s574_s5, %s574_s5 }
  0xdd   :  { %p614_p0 = scmp.ne.s32.totalorder %s574_s5, %s613_s23  ;;  %p619_p2 = scmp.lt.s32.totalorder %s613_s23, %s613_s23 }
  0xdf   :  { %589 = vmatmul.mubr.msk.f32.gmra.mxu1 %vm210_vm2, %v183_v51  ;;  %v466_v51 = vlaneseq  ;;  %p620_p3 = por %p619_p2, %p618_p1 }
  0xe0   :  { %299 = vmatprep.mubr.f32.mxu1 %v635_v3 }
  0xe1   :  { %vm564_vm3 = vcmp.lt.s32.totalorder %v466_v51, 256  ;;  %p621_p4 = pnand %p620_p3, %p614_p0 }
  0xe3   :  { %590 = vmatmul.mubr.msk.f32.gmra.mxu1 %vm210_vm2, %v184_v52  ;;  %v467_v52 = vshrl.u32 %v466_v51, 7 }
  0xe4   :  { %305 = vmatprep.mubr.f32.mxu1 %v635_v3 }
  0xe7   :  { %591 = vmatmul.mubr.msk.f32.gmra.mxu1 %vm210_vm2, %v185_v53  ;;  %v637_v53 = vmov 1966171168  }
  0xe8   :  { %537 = vmatprep.mubr.f32.mxu1 %v635_v3 }
 0x19b   :  { %v289_v54 = vpop.f32.mrf.mxu1 }
 0x19c   :  { %v290_v13 = vadd.f32 %v289_v54, %v193_v8  ;;  %v548_v54 = vunpack.c.l.s4 %v637_v53 }
 0x19d   :  { %v291_v55 = vpop.f32.mrf.mxu1 }
 0x19e   :  { %v292_v11 = vadd.f32 %v291_v55, %v193_v8  ;;  %v312_v18 = vmax.f32 %v290_v13, 0.0  ;;  %v468_v55 = vsub.s32 0, %v467_v52 }
 0x19f   :  { %v295_v56 = vpop.f32.mrf.mxu1 }
 0x1a0   :  { %v296_v9 = vadd.f32 %v295_v56, %v198_v4  ;;  %v313_v17 = vmax.f32 %v292_v11, 0.0 }
 0x1a1   :  { %v297_v57 = vpop.f32.mrf.mxu1 }
 0x1a2   :  { %v298_v6 = vadd.f32 %v297_v57, %v198_v4  ;;  %v314_v16 = vmax.f32 %v296_v9, 0.0  ;;  %v549_v57 = vunpack.c.0.s8 %v548_v54 }
 0x1a3   :  { %v301_v58 = vpop.f32.mrf.mxu1 }
 0x1a4   :  { %v302_v5 = vadd.f32 %v301_v58, %v203_v61  ;;  %v315_v15 = vmax.f32 %v298_v6, 0.0 }
 0x1a5   :  { %v303_v60 = vpop.f32.mrf.mxu1 }
 0x1a6   :  { %v304_v1 = vadd.f32 %v303_v60, %v203_v61  ;;  %v316_v14 = vmax.f32 %v302_v5, 0.0 }
 0x1a7   :  { %v307_v62 = vpop.f32.mrf.mxu1 }
 0x1a8   :  { %v308_v63 = vadd.f32 %v307_v62, %v208_v59  ;;  %v317_v12 = vmax.f32 %v304_v1, 0.0 }
 0x1a9   :  { %v309_v0 = vpop.f32.mrf.mxu1 }
 0x1aa   :  { %v310_v2 = vadd.f32 %v309_v0, %v208_v59  ;;  %v318_v10 = vmax.f32 %v308_v63, 0.0  ;;  %v552_v63 = vsub.s32 %v549_v57, %v467_v52 }
 0x1ac   :  { %v319_v7 = vmax.f32 %v310_v2, 0.0 }
 0x1ae   :  { %386 = vmatprep.subr.mxu0 %v319_v7 }
 0x1af   :  { %387 = vmatpush1.msra.mxu0 %v318_v10 }
 0x1b0   :  { %388 = vmatprep.subr.mxu0 %v317_v12 }
 0x1b1   :  { %389 = vmatpush1.msra.mxu0 %v316_v14 }
 0x1b2   :  { %390 = vmatprep.subr.mxu0 %v315_v15 }
 0x1b3   :  { %391 = vmatpush1.msra.mxu0 %v314_v16 }
 0x1b4   :  { %392 = vmatprep.subr.mxu0 %v313_v17 }
 0x1b5   :  { %393 = vmatpush1.msra.mxu0 %v312_v18 }
 0x1b6   :  { %600 = vmatmul.mubr.msk.f32.vlgmr.msra.gmra.mxu0 %vm210_vm2, %v592_v19 }
 0x1b7   :  { %432 = vmatprep.mubr.f32.mxu0 %v635_v3 }
 0x1ba   :  { %601 = vmatmul.mubr.msk.f32.gmra.mxu0 %vm210_vm2, %v593_v20 }
 0x1bb   :  { %438 = vmatprep.mubr.f32.mxu0 %v635_v3 }
 0x1be   :  { %602 = vmatmul.mubr.msk.f32.gmra.mxu0 %vm210_vm2, %v594_v21 }
 0x1bf   :  { %444 = vmatprep.mubr.f32.mxu0 %v635_v3  ;;  %v338_v3 = vpop.permute.xlu0 %337 }
 0x1c2   :  { %603 = vmatmul.mubr.msk.f32.gmra.mxu0 %vm210_vm2, %v595_v22 }
 0x1c3   :  { %v464_v56 = vpop.permute.xlu0 %463 }
 0x1c4   :  { %v469_v59 = vrot.slane %v464_v56, %v468_v55 }
 0x276   :  { %v428_v23 = vpop.f32.mrf.mxu0 }
 0x277   :  { %v429_v44 = vadd.f32 %v428_v23, %v333_v39 }
 0x278   :  { %v430_v24 = vpop.f32.mrf.mxu0 }
 0x279   :  { %v431_v42 = vadd.f32 %v430_v24, %v333_v39  ;;  %v451_v49 = vmax.f32 %v429_v44, 0.0 }
 0x27a   :  { %v434_v25 = vpop.f32.mrf.mxu0 }
 0x27b   :  { %v435_v40 = vadd.f32 %v434_v25, %v338_v3  ;;  %v452_v48 = vmax.f32 %v431_v42, 0.0 }
 0x27c   :  { %v436_v26 = vpop.f32.mrf.mxu0 }
 0x27d   :  { %v437_v37 = vadd.f32 %v436_v26, %v338_v3  ;;  %v453_v47 = vmax.f32 %v435_v40, 0.0 }
 0x27e   :  { %v440_v27 = vpop.f32.mrf.mxu0 }
 0x27f   :  { %v441_v36 = vadd.f32 %v440_v27, %v343_v30  ;;  %v454_v46 = vmax.f32 %v437_v37, 0.0 }
 0x280   :  { %v442_v29 = vpop.f32.mrf.mxu0 }
 0x281   :  { %v443_v34 = vadd.f32 %v442_v29, %v343_v30  ;;  %v455_v45 = vmax.f32 %v441_v36, 0.0 }
 0x282   :  { %v446_v31 = vpop.f32.mrf.mxu0 }
 0x283   :  { %v447_v32 = vadd.f32 %v446_v31, %v348_v28  ;;  %v456_v43 = vmax.f32 %v443_v34, 0.0 }
 0x284   :  { %v448_v33 = vpop.f32.mrf.mxu0 }
 0x285   :  { %v449_v35 = vadd.f32 %v448_v33, %v348_v28  ;;  %v457_v41 = vmax.f32 %v447_v32, 0.0 }
 0x287   :  { %v458_v38 = vmax.f32 %v449_v35, 0.0 }
 0x289   :  { %497 = vmatprep.subr.mxu1 %v458_v38 }
 0x28a   :  { %498 = vmatpush1.msra.mxu1 %v457_v41 }
 0x28b   :  { %499 = vmatprep.subr.mxu1 %v456_v43 }
 0x28c   :  { %500 = vmatpush1.msra.mxu1 %v455_v45 }
 0x28d   :  { %501 = vmatprep.subr.mxu1 %v454_v46 }
 0x28e   :  { %502 = vmatpush1.msra.mxu1 %v453_v47 }
 0x28f   :  { %503 = vmatprep.subr.mxu1 %v452_v48 }
 0x290   :  { %504 = vmatpush1.msra.mxu1 %v451_v49 }
 0x291   :  { %604 = vmatmul.mubr.msk.f32.vlgmr.msra.gmra.mxu1 %vm210_vm2, %v459_v50 }
 0x351   :  { %v539_v58 = vpop.f32.mrf.mxu1 }
 0x352   :  { %v540_v61 = vadd.f32 %v539_v58, %v469_v59 }
 0x353   :  { %v541_v60 = vpop.f32.mrf.mxu1 }
 0x354   :  { %v542_v62 = vadd.f32 %v541_v60, %v469_v59 }
 0x356   :  { %v546_v0 = vcombine.low %v540_v61, %v542_v62 }
 0x358   :  { %v553_v1 = vrot.slane %v546_v0, %v552_v63 }
 0x35a   :  { %v560_v2 = vrot.slane %v553_v1, %v552_v63 }
 0x35c   :  { %566 = vst.msk [vmem:[#allocation3] sm:$0x3] %vm564_vm3, %v560_v2 }
 0x35d   :  { %624 = shalt.err (!%p621_p4)
}
 0x35e   :  { %576 = dma.vmem_to_hbm [thread:$0]  %s574_s5, 32, %s796_s7, [#allocation4]  }
 0x35f   :  { %633 = dma.done.wait [#allocation4], 32  }
 0x360   :  { %634 = vsyncadd [#allocation4], 4294967264 }
 0x361   :  { %580 = vsyncpa [#allocation4], 1 }

</bundles_post_ra>
